<compile_context>
chip_gen: v7x
topology: tpu7x:2x2x1
jax: 0.10.0
libtpu: 0.0.40
codegen_flags: <defaults>
</compile_context>

<pallas_src>
import numpy as np
import jax
import jax.numpy as jnp
from jax import lax
from jax.experimental import pallas as pl
from jax.experimental.pallas import tpu as pltpu


# ---------------------------------------------------------------------------
# Host-side pooling-plan construction
# ---------------------------------------------------------------------------

def _build_pool_matrix(W, Wo, ch_list):
    """Block-diagonal pooling matrix for a group of output rows.

    ch_list[r] in {1, 2} = number of valid input rows for the r-th output row
    of the group (2 for full windows, 1 for the odd-H ceil_mode tail).
    Shape: (sum(ch_list)*W, len(ch_list)*Wo); entry = 1/(ch*cw) where cw is the
    number of valid input columns of that output column (ceil_mode divisor).
    """
    g = len(ch_list)
    in_rows = int(sum(ch_list))
    P = np.zeros((in_rows * W, g * Wo), np.float32)
    row_off = 0
    for r, ch in enumerate(ch_list):
        for ow in range(Wo):
            ws, we = 2 * ow, min(2 * ow + 2, W)
            coef = 1.0 / (ch * (we - ws))
            for rr in range(ch):
                for w in range(ws, we):
                    P[(row_off + rr) * W + w, r * Wo + ow] = coef
        row_off += ch
    return P


def _make_group_plan(H, W):
    """Group output rows so each pooling matmul has >=128 output lanes
    (when possible) and one lane-dense store per image is produced."""
    Ho, Wo = -(-H // 2), -(-W // 2)
    ch_all = [min(2, H - 2 * oh) for oh in range(Ho)]
    kb = min(Ho, max(1, -(-128 // Wo)))          # target kb*Wo >= 128
    plans = []                                    # (in_row_start, in_rows, mat_idx)
    mat_keys = {}
    oh = 0
    while oh < Ho:
        g = min(kb, Ho - oh)
        key = tuple(ch_all[oh:oh + g])
        if key not in mat_keys:
            mat_keys[key] = len(mat_keys)
        plans.append((2 * oh, int(sum(key)), mat_keys[key]))
        oh += g
    mats = [None] * len(mat_keys)
    for key, idx in mat_keys.items():
        mats[idx] = jnp.asarray(_build_pool_matrix(W, Wo, list(key)),
                                dtype=jnp.bfloat16)
    return Ho, Wo, plans, mats


# ---------------------------------------------------------------------------
# Kernel
# ---------------------------------------------------------------------------

def _make_transition_kernel(bn, Cout, H, W, plans, n_mats):
    HW = H * W

    def kernel(x_ref, w_ref, scale_ref, shift_ref, *rest):
        # x_ref:     (bn, Cin, H*W)   f32/bf16 activations (NCHW, spatial flat)
        # w_ref:     (Cout, Cin)      bf16 1x1-conv weight (unscaled)
        # scale_ref: (Cout, 1)        f32 folded BN scale
        # shift_ref: (Cout, 1)        f32 folded BN shift
        # rest[:n_mats]: bf16 block-diagonal pooling matrices
        # rest[n_mats]:  (bn, Cout, Ho*Wo) bf16 output
        p_refs = rest[:n_mats]
        o_ref = rest[n_mats]

        # Hoisted out of the batch loop: weight, pooling matrices and the
        # per-channel BN affine broadcasts (broadcast_in_dim is not CSE'd).
        w = w_ref[...]
        p_vals = [p_refs[i][...] for i in range(n_mats)]
        scale_b = jnp.broadcast_to(scale_ref[...], (Cout, HW))
        shift_b = jnp.broadcast_to(shift_ref[...], (Cout, HW))

        def per_image(n):
            # Cast after the DMA (no separate wrapper cast pass over HBM).
            xn = x_ref[n].astype(jnp.bfloat16)                       # (Cin, HW)
            # 1x1 conv on the MXU, f32 accumulation.
            y = jnp.dot(w, xn, preferred_element_type=jnp.float32)   # (Cout, HW)
            # BN affine (f32) + ReLU, then bf16 for the pooling stage.
            y = jnp.maximum(y * scale_b + shift_b, 0.0).astype(jnp.bfloat16)
            # TODO(synk): training-mode dropout (p=0.2) omitted; eval-mode dropout is identity.

            # avg_pool2d(2, ceil_mode=True): per group of output rows, one
            # matmul against a block-diagonal matrix with the 2-row sum and
            # ceil_mode divisors folded in.  Input slices are contiguous lane
            # ranges with static offsets.
            parts = []
            for (in_start, in_rows, mid) in plans:
                blk = y[:, in_start * W:(in_start + in_rows) * W]
                pooled = jnp.dot(blk, p_vals[mid],
                                 preferred_element_type=jnp.float32)
                parts.append(pooled.astype(o_ref.dtype))
            out_img = parts[0] if len(parts) == 1 else jnp.concatenate(parts, axis=1)
            # Single lane-dense store per image.
            o_ref[n] = out_img

        if bn <= 2:
            for n in range(bn):          # tiny static unroll
                per_image(n)
        else:
            def body(n, carry):          # bounded live ranges across the batch
                per_image(n)
                return carry
            lax.fori_loop(0, bn, body, 0, unroll=2)

    return kernel


# ---------------------------------------------------------------------------
# Wrapper
# ---------------------------------------------------------------------------

def _pick_batch_block(n, bytes_per_image, cap_bytes=4 << 20):
    """Largest divisor of n with the x block under ~4 MiB, and at most n//2
    so the grid has >=2 steps (v7x has 2 TensorCores)."""
    bn = max(1, min(n, cap_bytes // max(1, bytes_per_image)))
    if n >= 2:
        bn = min(bn, n // 2)
    bn = max(1, bn)
    while n % bn:
        bn -= 1
    return bn


def transition_forward(x_nchw, conv_w, gamma, beta, running_mean, running_var,
                       eps=1e-5, use_dropout=True, out_dtype=jnp.bfloat16):
    # `use_dropout` only matters in training mode; eval-mode dropout is identity.
    N, Cin, H, W = x_nchw.shape
    Cout = conv_w.shape[0]
    HW = H * W
    Ho, Wo, plans, mats = _make_group_plan(H, W)
    OW = Ho * Wo

    # Inference BatchNorm folded into a per-channel f32 affine applied in the
    # kernel epilogue (weight stays unscaled bf16 -> no quantization of scale*w).
    inv_std = lax.rsqrt(running_var.astype(jnp.float32) + eps)
    scale = (gamma.astype(jnp.float32) * inv_std).reshape(Cout, 1)
    shift = (beta.astype(jnp.float32)
             - running_mean.astype(jnp.float32) * scale[:, 0]).reshape(Cout, 1)
    w_bf16 = conv_w[:, :, 0, 0].astype(jnp.bfloat16)                 # (Cout, Cin)

    # NCHW kept as-is: free reshape, no transpose, no wrapper dtype-cast pass.
    x_flat = x_nchw.reshape(N, Cin, HW)

    bn = _pick_batch_block(N, Cin * HW * x_flat.dtype.itemsize)
    grid = (N // bn,)
    n_mats = len(mats)
    kernel = _make_transition_kernel(bn, Cout, H, W, plans, n_mats)

    in_specs = [
        pl.BlockSpec((bn, Cin, HW), lambda i: (i, 0, 0)),
        pl.BlockSpec((Cout, Cin), lambda i: (0, 0)),
        pl.BlockSpec((Cout, 1), lambda i: (0, 0)),
        pl.BlockSpec((Cout, 1), lambda i: (0, 0)),
    ] + [pl.BlockSpec(m.shape, lambda i: (0, 0)) for m in mats]

    out_flat = pl.pallas_call(
        kernel,
        out_shape=jax.ShapeDtypeStruct((N, Cout, OW), out_dtype),
        grid_spec=pltpu.PrefetchScalarGridSpec(
            num_scalar_prefetch=0,
            grid=grid,
            in_specs=in_specs,
            out_specs=pl.BlockSpec((bn, Cout, OW), lambda i: (i, 0, 0)),
        ),
        compiler_params=pltpu.CompilerParams(
            dimension_semantics=("parallel",),
            vmem_limit_bytes=40 * 1024 * 1024,   # safe on v5e/v6e/v7x for the 4 MiB block cap
        ),
    )(x_flat, w_bf16, scale, shift, *mats)

    # (N, Cout, Ho*Wo) -> NCHW output, free reshape (no transpose).
    return out_flat.reshape(N, Cout, Ho, Wo)


# ---------------------------------------------------------------------------
# Pure-JAX f32 reference (PyTorch avg_pool2d(2, ceil_mode=True) semantics)
# ---------------------------------------------------------------------------

def transition_reference(x, conv_w, gamma, beta, mean, var, eps=1e-5):
    y = jnp.einsum('nchw,oc->nohw', x, conv_w[:, :, 0, 0])
    inv_std = lax.rsqrt(var + eps)
    y = (y - mean[None, :, None, None]) * (gamma * inv_std)[None, :, None, None] \
        + beta[None, :, None, None]
    y = jnp.maximum(y, 0.0)
    N, C, H, W = y.shape
    Ho, Wo = -(-H // 2), -(-W // 2)
    yp = jnp.pad(y, ((0, 0), (0, 0), (0, 2 * Ho - H), (0, 2 * Wo - W)))
    s = yp.reshape(N, C, Ho, 2, Wo, 2).sum(axis=(3, 5))
    ch = jnp.minimum(2, H - 2 * jnp.arange(Ho)).astype(jnp.float32)
    cw = jnp.minimum(2, W - 2 * jnp.arange(Wo)).astype(jnp.float32)
    return s / (ch[:, None] * cw[None, :])[None, None]


if __name__ == "__main__":
    key = jax.random.PRNGKey(0)

    def make_case(k, N, Cin, Cout, H, W):
        k1, k2, k3, k4, k5, k6 = jax.random.split(k, 6)
        x = jax.random.normal(k1, (N, Cin, H, W), jnp.float32)
        conv_w = jax.random.normal(k2, (Cout, Cin, 1, 1), jnp.float32) / np.sqrt(Cin)
        gamma = 1.0 + 0.1 * jax.random.normal(k3, (Cout,), jnp.float32)
        beta = 0.1 * jax.random.normal(k4, (Cout,), jnp.float32)
        mean = 0.1 * jax.random.normal(k5, (Cout,), jnp.float32)
        var = jnp.abs(jax.random.normal(k6, (Cout,), jnp.float32)) + 0.5
        return x, conv_w, gamma, beta, mean, var

    cases = [
        (2, 8, 16, 16, 16),   # even spatial, single pooling group
        (2, 8, 16, 15, 9),    # odd H and W: ceil_mode partial windows
        (2, 8, 16, 9, 131),   # odd W > 128: lane-tile-crossing slices, multiple groups
        (8, 8, 16, 16, 16),   # bn > 2: exercises the fori_loop batch path
    ]
    for (N, Cin, Cout, H, W) in cases:
        key, sub = jax.random.split(key)
        x, conv_w, gamma, beta, mean, var = make_case(sub, N, Cin, Cout, H, W)
        out = transition_forward(x, conv_w, gamma, beta, mean, var, use_dropout=True)
        out = jax.block_until_ready(out)
        Ho, Wo = -(-H // 2), -(-W // 2)
        assert out.shape == (N, Cout, Ho, Wo), out.shape
        ref = transition_reference(x, conv_w, gamma, beta, mean, var)
        # bf16 conv/pool operands and bf16 output (f32 accumulation) vs f32 reference
        np.testing.assert_allclose(np.asarray(out.astype(jnp.float32)),
                                   np.asarray(ref), rtol=3e-2, atol=5e-2)
    print("KERNEL_OK")
</pallas_src>

<mosaic_0001>
module attributes {stable_mosaic.version = 11 : i64} {
  func.func @kernel(%arg0: i32, %arg1: memref<1x8x256xf32, #tpu.memory_space<vmem>>, %arg2: memref<16x8xbf16, #tpu.memory_space<vmem>>, %arg3: memref<16x1xf32, #tpu.memory_space<vmem>>, %arg4: memref<16x1xf32, #tpu.memory_space<vmem>>, %arg5: memref<256x64xbf16, #tpu.memory_space<vmem>>, %arg6: memref<1x16x64xbf16, #tpu.memory_space<vmem>>) attributes {dimension_semantics = [#tpu.dimension_semantics<parallel>], iteration_bounds = array<i64: 2>, scalar_prefetch = 0 : i64, scratch_operands = 0 : i64, tpu.core_type = #tpu.core_type<tc>, window_params = [{transform_indices = @transform_0, window_bounds = array<i64: 1, 8, 256>}, {pipeline_mode = #tpu.pipeline_mode<synchronous>, transform_indices = @transform_1, window_bounds = array<i64: 16, 8>}, {pipeline_mode = #tpu.pipeline_mode<synchronous>, transform_indices = @transform_2, window_bounds = array<i64: 16, 1>}, {pipeline_mode = #tpu.pipeline_mode<synchronous>, transform_indices = @transform_3, window_bounds = array<i64: 16, 1>}, {pipeline_mode = #tpu.pipeline_mode<synchronous>, transform_indices = @transform_4, window_bounds = array<i64: 256, 64>}, {transform_indices = @transform_5, window_bounds = array<i64: 1, 16, 64>}]} {
    %c0 = arith.constant 0 : index
    %c0_0 = arith.constant 0 : index
    %0 = vector.load %arg2[%c0, %c0_0] : memref<16x8xbf16, #tpu.memory_space<vmem>>, vector<16x8xbf16>
    %c0_1 = arith.constant 0 : index
    %c0_2 = arith.constant 0 : index
    %1 = vector.load %arg5[%c0_1, %c0_2] : memref<256x64xbf16, #tpu.memory_space<vmem>>, vector<256x64xbf16>
    %c0_3 = arith.constant 0 : index
    %c0_4 = arith.constant 0 : index
    %2 = vector.load %arg3[%c0_3, %c0_4] : memref<16x1xf32, #tpu.memory_space<vmem>>, vector<16x1xf32>
    %3 = vector.shape_cast %2 : vector<16x1xf32> to vector<16x1xf32>
    %4 = vector.broadcast %3 : vector<16x1xf32> to vector<16x256xf32>
    %c0_5 = arith.constant 0 : index
    %c0_6 = arith.constant 0 : index
    %5 = vector.load %arg4[%c0_5, %c0_6] : memref<16x1xf32, #tpu.memory_space<vmem>>, vector<16x1xf32>
    %6 = vector.shape_cast %5 : vector<16x1xf32> to vector<16x1xf32>
    %7 = vector.broadcast %6 : vector<16x1xf32> to vector<16x256xf32>
    %c0_7 = arith.constant 0 : index
    %c0_8 = arith.constant 0 : index
    %c0_9 = arith.constant 0 : index
    %8 = vector.load %arg1[%c0_7, %c0_8, %c0_9] : memref<1x8x256xf32, #tpu.memory_space<vmem>>, vector<1x8x256xf32>
    %9 = vector.shape_cast %8 : vector<1x8x256xf32> to vector<8x256xf32>
    %10 = arith.truncf %9 : vector<8x256xf32> to vector<8x256xbf16>
    %cst = arith.constant dense<0.000000e+00> : vector<16x256xf32>
    %11 = tpu.matmul %0, %10, %cst {dimension_numbers = #tpu.dot_dimension_numbers<[1], [0], [0], [1], [0, 0, 1, 1], [], []>} : vector<16x8xbf16>, vector<8x256xbf16>, vector<16x256xf32> -> vector<16x256xf32>
    %12 = arith.mulf %11, %4 : vector<16x256xf32>
    %13 = arith.addf %12, %7 : vector<16x256xf32>
    %cst_10 = arith.constant 0.000000e+00 : f32
    %14 = vector.broadcast %cst_10 : f32 to vector<16x256xf32>
    %15 = arith.maximumf %13, %14 : vector<16x256xf32>
    %16 = arith.truncf %15 : vector<16x256xf32> to vector<16x256xbf16>
    %cst_11 = arith.constant dense<0.000000e+00> : vector<16x64xf32>
    %17 = tpu.matmul %16, %1, %cst_11 {dimension_numbers = #tpu.dot_dimension_numbers<[1], [0], [0], [1], [0, 0, 1, 1], [], []>} : vector<16x256xbf16>, vector<256x64xbf16>, vector<16x64xf32> -> vector<16x64xf32>
    %18 = arith.truncf %17 : vector<16x64xf32> to vector<16x64xbf16>
    %c0_12 = arith.constant 0 : index
    %c0_13 = arith.constant 0 : index
    %c0_14 = arith.constant 0 : index
    %19 = vector.load %arg6[%c0_12, %c0_13, %c0_14] : memref<1x16x64xbf16, #tpu.memory_space<vmem>>, vector<1x16x64xbf16>
    %20 = vector.shape_cast %19 : vector<1x16x64xbf16> to vector<16x64xbf16>
    %21 = vector.shape_cast %18 : vector<16x64xbf16> to vector<1x16x64xbf16>
    tpu.vector_store %arg6[%c0_12, %c0_13, %c0_14], %21 {strides = array<i32>} : memref<1x16x64xbf16, #tpu.memory_space<vmem>>, vector<1x16x64xbf16>,
    return
  }
  func.func @transform_0(%arg0: i32) -> (i32, i32, i32) {
    %c0_i32 = arith.constant 0 : i32
    %c0_i32_0 = arith.constant 0 : i32
    %c0_i32_1 = arith.constant 0 : i32
    return %arg0, %c0_i32, %c0_i32_0 : i32, i32, i32
  }
  func.func @transform_1(%arg0: i32) -> (i32, i32) {
    %c0_i32 = arith.constant 0 : i32
    %c0_i32_0 = arith.constant 0 : i32
    %c0_i32_1 = arith.constant 0 : i32
    return %c0_i32, %c0_i32_0 : i32, i32
  }
  func.func @transform_2(%arg0: i32) -> (i32, i32) {
    %c0_i32 = arith.constant 0 : i32
    %c0_i32_0 = arith.constant 0 : i32
    %c0_i32_1 = arith.constant 0 : i32
    return %c0_i32, %c0_i32_0 : i32, i32
  }
  func.func @transform_3(%arg0: i32) -> (i32, i32) {
    %c0_i32 = arith.constant 0 : i32
    %c0_i32_0 = arith.constant 0 : i32
    %c0_i32_1 = arith.constant 0 : i32
    return %c0_i32, %c0_i32_0 : i32, i32
  }
  func.func @transform_4(%arg0: i32) -> (i32, i32) {
    %c0_i32 = arith.constant 0 : i32
    %c0_i32_0 = arith.constant 0 : i32
    %c0_i32_1 = arith.constant 0 : i32
    return %c0_i32, %c0_i32_0 : i32, i32
  }
  func.func @transform_5(%arg0: i32) -> (i32, i32, i32) {
    %c0_i32 = arith.constant 0 : i32
    %c0_i32_0 = arith.constant 0 : i32
    %c0_i32_1 = arith.constant 0 : i32
    return %arg0, %c0_i32, %c0_i32_0 : i32, i32, i32
  }
}

</mosaic_0001>

<bundles_post_ra>
// kernel: tpu_custom_call.1
= control target key start
LH: loop header
LB: loop body
LE: loop exit
PB: predicated region body
PF: predicated region fallthrough
CT: control target
= control target key end

     0   :  { %10 = vsyncpa [#allocation3], 0  ;;  %s967_s0 = inlined_call_operand.vmem [shape: f32[2,8,256], index: 0, kind: input, shape index: {}]   ;;  %s968_s1 = inlined_call_operand.vmem [shape: bf16[16,8], index: 1, kind: input, shape index: {}]   ;;  %s969_s2 = inlined_call_operand.vmem [shape: f32[16,1], index: 2, kind: input, shape index: {}]   ;;  %s970_s3 = inlined_call_operand.vmem [shape: f32[16,1], index: 3, kind: input, shape index: {}]   ;;  %s971_s4 = inlined_call_operand.vmem [shape: bf16[256,64], index: 4, kind: input, shape index: {}]   ;;  %s972_s5 = inlined_call_operand.hbm [shape: bf16[2,16,64], index: 5, kind: output, shape index: {}]  }
   0x1   :  { %12 = vsyncpa [#allocation3 + $0x1], 0  ;;  %s801_s18 = smov 0   ;;  %s803_s19 = smov 0  }
   0x2   :  { %s805_s20 = smov 0   ;;  %s807_s21 = smov 0  }
   0x3 LB: > { %s822_s22 = sadd.s32 4294967295, %s765_s21   ;;  %s583_s23 = sadd.s32 4294967294, %s765_s21   ;;  %s765_s21 = sphi %s807_s21, %s978_s21   ;;  %s761_s20 = sphi %s805_s20, %s977_s20   ;;  %s757_s19 = sphi %s803_s19, %s976_s19   ;;  %s753_s18 = sphi %s801_s18, %s975_s18  }
   0x4   : > { %s826_s24 = sadd.s32 1, %s765_s21   ;;  %s135_s25 = sadd.s32 1, %s761_s20 }
   0x5   : > { %s132_s26 = ssub.s32 %s765_s21, %s826_s24  ;;  %p145_p0 = scmp.ne.s32.totalorder %s761_s20, %s757_s19 }
   0x6   : > { %p133_p1 = scmp.eq.s32.totalorder %s132_s26, 0  ;;  %p146_p2 = scmp.eq.s32.totalorder %s822_s22, 1 }
   0x7   : > { %p151_p3 = scmp.ne.s32.totalorder %s757_s19, %s753_s18  ;;  %p152_p4 = scmp.eq.s32.totalorder %s583_s23, 1 }
   0x8   : > { %s837_s27 = scalar_select %p133_p1, %s761_s20, %s135_s25  }
   0x9   : > { %p839_p5 = por %p146_p2, %p145_p0  ;;  %p843_p6 = por %p152_p4, %p151_p3 }
   0xa   : > { %p586_p7 = scmp.ge.s32.totalorder %s765_s21, 1  ;;  %p190_p8 = scmp.lt.s32.totalorder %s765_s21, 3 }
   0xc   : > { %p191_p9 = pnand %p586_p7, %p190_p8 }
   0xd   : > { %p218_p10 = scmp.lt.s32.totalorder (!%p191_p9), %s822_s22, 1  ;;  %v767_v0 = vmov (!%p191_p9), 0   ;;  %v258_v1 = vld [vmem:[%s969_s2] sm:$0xff] (!%p191_p9)  ;;  %v259_v3 = vld [vmem:[%s969_s2 + $0x8] sm:$0xff] (!%p191_p9)  ;;  %vm295_vm0 = vcmask (!%p191_p9), 1043456   ;;  %v691_v13 = vld [vmem:[%s971_s4 + $0x50] sm:$0xff] (!%p191_p9)  }
   0xe   : > { %194 = sbr.rel (%p191_p9) target bundleno = 490 (0x1ea), region = 40  ;;  %334 = vmatprep.mubr.bf16.mxu0 (!%p191_p9), %v767_v0  ;;  %684 = vset.pattern.permute.xlu0 (!%p191_p9), %v767_v0  ;;  %v270_v2 = vld [vmem:[%s970_s3] sm:$0xff] (!%p191_p9)  ;;  %v271_v4 = vld [vmem:[%s970_s3 + $0x8] sm:$0xff] (!%p191_p9)  ;;  %vm291_vm1 = vcmask (!%p191_p9), 64512   ;;  %v692_v16 = vld [vmem:[%s971_s4 + $0x10] sm:$0xff] (!%p191_p9)   ;;  %s215_s26 = sand.u32 (!%p191_p9), 1, %s757_s19  }
   0xf   : > { %262 = vperm.xlu0 (!%p191_p9), %684, %v258_v1   ;;  %685 = vset.pattern.permute.xlu1 (!%p191_p9), %v767_v0  ;;  %v687_v5 = vld [vmem:[%s971_s4 + $0x40] sm:$0xff] (!%p191_p9)   ;;  %v689_v7 = vld [vmem:[%s971_s4 + $0x48] sm:$0xff] (!%p191_p9)   ;;  %v693_v17 = vld [vmem:[%s971_s4 + $0x58] sm:$0xff] (!%p191_p9)   ;;  %s619_s8 = sshll.u32 (!%p191_p9), %s822_s22, 7  ;;  %vm504_vm2 = vcmask (!%p191_p9), 519168   ;;  %s926_s12 = scalar_lea.sflag (!%p191_p9), [#allocation3], %s215_s26 }
  0x10   : > { %274 = vperm.xlu1 (!%p191_p9), %685, %v270_v2   ;;  %v688_v6 = vld [vmem:[%s971_s4] sm:$0xff] (!%p191_p9)   ;;  %620 = vmatprep.subr.bf16.mxu1 (!%p191_p9), %v687_v5  ;;  %v690_v12 = vld [vmem:[%s971_s4 + $0x8] sm:$0xff] (!%p191_p9)   ;;  %v694_v18 = vld [vmem:[%s971_s4 + $0x18] sm:$0xff] (!%p191_p9)   ;;  %s924_s11 = scalar_lea.hbm (!%p191_p9), %s972_s5, %s619_s8  ;;  %s768_s13 = smov (!%p191_p9), [#allocation2]  }
  0x11   : > { %621 = vmatpush3.bf16.msra.mxu1 (!%p191_p9), %v688_v6  ;;  %v686_v15 = vld [vmem:[%s968_s1] sm:$0xff] (!%p191_p9)   ;;  %v697_v21 = vld [vmem:[%s971_s4 + $0x68] sm:$0xff] (!%p191_p9)   ;;  %v699_v23 = vld [vmem:[%s971_s4 + $0x70] sm:$0xff] (!%p191_p9)   ;;  %s707_s14 = sshll.u32 (!%p191_p9), %s768_s13, 4  ;;  %s708_s14 = int_to_ptr.vmem [resolvable:$false] %s707_s14 }
  0x12   : > { %622 = vmatprep.subr.bf16.mxu1 (!%p191_p9), %v689_v7  ;;  %v695_v19 = vld [vmem:[%s971_s4 + $0x60] sm:$0xff] (!%p191_p9)   ;;  %v698_v22 = vld [vmem:[%s971_s4 + $0x28] sm:$0xff] (!%p191_p9)   ;;  %v700_v24 = vld [vmem:[%s971_s4 + $0x30] sm:$0xff] (!%p191_p9)   ;;  %s709_s15 = scalar_lea.vmem (!%p191_p9), %s708_s14, 256 }
  0x13   : > { %267 = vperm.xlu0 (!%p191_p9), %684, %v259_v3   ;;  %v696_v20 = vld [vmem:[%s971_s4 + $0x20] sm:$0xff] (!%p191_p9)   ;;  %v701_v25 = vld [vmem:[%s971_s4 + $0x78] sm:$0xff] (!%p191_p9)  }
  0x14   : > { %279 = vperm.xlu1 (!%p191_p9), %685, %v271_v4   ;;  %v702_v26 = vld [vmem:[%s971_s4 + $0x38] sm:$0xff] (!%p191_p9)  }
  0x15   : > { %s219_s9 = scalar_select %p218_p10, %s822_s22, 1  ;;  %623 = vmatpush3.bf16.msra.mxu1 %v690_v12 }
  0x16   : > { %624 = vmatprep.subr.bf16.mxu1 %v691_v13 }
  0x17   : > { %s616_s16 = sshll.u32 %s219_s9, 4 }
  0x18   : > { %s222_s30 = scalar_lea.vmem %s967_s0, %s616_s16 }
  0x19   : > { %v283_v8 = vld [vmem:[%s222_s30 + $0x8] sm:$0xff]  ;;  %v282_v9 = vld [vmem:[%s222_s30] sm:$0xff]  ;;  %625 = vmatpush3.bf16.msra.mxu1 %v692_v16  ;;  %s587_s30 = sshll.u32 %s215_s26, 3 }
  0x1a   : > { %v285_v10 = vpack.c.bf16 %v283_v8, %v283_v8  ;;  %v284_v11 = vpack.c.bf16 %v282_v9, %v282_v9  ;;  %626 = vmatprep.subr.bf16.mxu1 %v693_v17  ;;  %s217_s6 = scalar_lea.vmem [#allocation2], %s587_s30 }
  0x1b   : > { %s521_s7 = sshll.u32 %s217_s6, 4  ;;  %s919_s7 = int_to_ptr.vmem [resolvable:$true] %s521_s7 }
  0x1c   : > { %591 = vmatprep.subr.msk.bf16.mxu0 %vm295_vm0, %v285_v10  ;;  %v297_v14 = vsel %vm295_vm0, %v284_v11, 0  ;;  %s703_s22 = scalar_lea.vmem %s919_s7, 128  ;;  %p710_p0 = scmp.lt.s32.totalorder %s919_s7, %s708_s14 }
  0x1d   : > { %303 = vmatpush1.bf16.msra.mxu0 %v297_v14  ;;  %627 = vmatpush3.bf16.msra.mxu1 %v694_v18  ;;  %p704_p11 = scmp.ne.s32.totalorder %s919_s7, %s703_s22  ;;  %p711_p1 = scmp.lt.s32.totalorder %s709_s15, %s703_s22 }
  0x1e   : > { %628 = vmatprep.subr.bf16.mxu1 %v695_v19 }
  0x1f   : > { %p705_p12 = pnand %p704_p11, %p839_p5  ;;  %p712_p2 = por %p711_p1, %p710_p0 }
  0x20   : > { %592 = vmatmul.mubr.msk.bf16.vlgmr.msra.gmra.mrb[0].mxu0 %vm291_vm1, %v686_v15 }
  0x21   : > { %629 = vmatpush3.bf16.msra.mxu1 %v696_v20  ;;  %p706_p13 = pneg %p705_p12 }
  0x22   : > { %630 = vmatprep.subr.bf16.mxu1 %v697_v21 }
  0x23   : > { %p713_p3 = pnand %p712_p2, %p706_p13 }
  0x25   : > { %631 = vmatpush3.bf16.msra.mxu1 %v698_v22 }
  0x26   : > { %632 = vmatprep.subr.bf16.mxu1 %v699_v23 }
  0x29   : > { %633 = vmatpush3.bf16.msra.mxu1 %v700_v24 }
  0x2a   : > { %634 = vmatprep.subr.bf16.mxu1 %v701_v25 }
  0x2d   : > { %635 = vmatpush3.bf16.msra.mxu1 %v702_v26 }
  0x8e   : > { %v263_v27 = vpop.permute.xlu0 %262 }
  0x8f   : > { %v275_v28 = vpop.permute.xlu1 %274 }
  0x92   : > { %v268_v32 = vpop.permute.xlu0 %267 }
  0x93   : > { %v280_v38 = vpop.permute.xlu1 %279 }
  0xf3   : > { %v336_v29 = vpop.f32.mrb[0].mxu0 }
  0xf4   : > { %v345_v30 = vmul.f32 %v336_v29, %v263_v27  ;;  %v338_v31 = vpop.f32.mrb[1].mxu0 }
  0xf5   : > { %v346_v33 = vmul.f32 %v338_v31, %v263_v27  ;;  %v340_v34 = vpop.f32.mrb[2].mxu0 }
  0xf6   : > { %v349_v35 = vadd.f32 %v345_v30, %v275_v28  ;;  %v347_v36 = vmul.f32 %v340_v34, %v268_v32  ;;  %v342_v37 = vpop.f32.mrb[3].mxu0 }
  0xf7   : > { %v348_v39 = vmul.f32 %v342_v37, %v268_v32  ;;  %v350_v40 = vadd.f32 %v346_v33, %v275_v28 }
  0xf8   : > { %v351_v41 = vadd.f32 %v347_v36, %v280_v38  ;;  %v353_v43 = vmax.f32 %v349_v35, 0.0 }
  0xf9   : > { %v352_v42 = vadd.f32 %v348_v39, %v280_v38  ;;  %v354_v45 = vmax.f32 %v350_v40, 0.0 }
  0xfa   : > { %v355_v44 = vmax.f32 %v351_v41, 0.0 }
  0xfb   : > { %v356_v46 = vmax.f32 %v352_v42, 0.0 }
  0xfc   : > { %v357_v47 = vpack.c.bf16 %v355_v44, %v353_v43 }
  0xfd   : > { %v358_v48 = vpack.c.bf16 %v356_v46, %v354_v45 }
  0xff   : > { %487 = vmatprep.mubr.bf16.mxu1 %v358_v48 }
 0x100   : > { %488 = vmatmul.mubr.bf16.vlgmr.msra.gmra.mrb[0].mxu1 %v357_v47 }
 0x1d3   : > { %v636_v49 = vpop.f32.mrb[0].mxu1 }
 0x1d4   : > { %v637_v50 = vpop.f32.mrb[1].mxu1 }
 0x1d5   : > { %v638_v51 = vadd.f32 %v637_v50, %v636_v49  ;;  %v639_v52 = vpop.f32.mrb[2].mxu1 }
 0x1d6   : > { %v640_v53 = vpop.f32.mrb[3].mxu1 }
 0x1d7   : > { %v617_v54 = vpack.c.bf16 %v638_v51, %v638_v51  ;;  %v641_v55 = vadd.f32 %v640_v53, %v639_v52 }
 0x1d9   : > { %505 = vst.msk [vmem:[%s217_s6] sm:$0xf] %vm504_vm2, %v617_v54  ;;  %v618_v56 = vpack.c.bf16 %v641_v55, %v641_v55 }
 0x1db   : > { %506 = vst.msk [vmem:[%s217_s6 + $0x4] sm:$0xf] %vm504_vm2, %v618_v56 }
 0x1dc   : > { %716 = shalt.err (!%p713_p3)
}
 0x1dd   : > { %s717_s16 = scalar_lea.hbm %s924_s11, 128  ;;  %s721_s25 = scalar_lea.hbm %s972_s5, 256 }
 0x1de   : > { %p718_p4 = scmp.ne.s32.totalorder %s924_s11, %s717_s16  ;;  %p722_p9 = scmp.lt.u32.totalorder %s924_s11, %s972_s5 }
 0x1df   : > { %p723_p10 = scmp.lt.u32.totalorder %s721_s25, %s717_s16  ;;  %p725_p12 = scmp.lt.u32.totalorder %s717_s16, %s924_s11 }
 0x1e0   : > { %p719_p7 = pnand %p718_p4, %p839_p5 }
 0x1e1   : > { %p724_p11 = por %p723_p10, %p722_p9 }
 0x1e2   : > { %p720_p8 = pneg %p719_p7 }
 0x1e3   : > { %p726_p13 = por %p725_p12, %p724_p11 }
 0x1e5   : > { %p727_p0 = pnand %p726_p13, %p720_p8 }
 0x1e7   : > { %730 = shalt.err (!%p727_p0)
}
 0x1e8   : > { %s769_s6 = smov 64   ;;  %s770_s8 = smov 4  }
 0x1e9   : > { %642 = dma.vmem_to_hbm [thread:$0]  (%p839_p5), %s919_s7, 128, %s924_s11, %s926_s12, %s769_s6, %s769_s6, %s770_s8  }
 0x1ea PF: > { %p648_p1 = scmp.ge.s32.totalorder %s765_s21, 2  ;;  %s536_s9 = sand.u32 1, %s753_s18  }
 0x1eb   : > { %s537_s10 = scalar_lea.sflag [#allocation3], %s536_s9 }
 0x1ec   : > { %p645_p2 = pnand %p648_p1, %p843_p6 }
 0x1ee   : > { %748 = dma.done.wait (!%p645_p2), %s537_s10, 128  }
 0x1ef   : > { %750 = vsyncadd (!%p645_p2), %s537_s10, 4294967168  ;;  %p15_p3 = scmp.ge.s32.totalorder %s826_s24, 4   ;;  %s975_s18 = smov %s757_s19 }
 0x1f0   : > { %s976_s19 = smov %s761_s20  ;;  %s977_s20 = smov %s837_s27 }
 0x1f1   : > { %s978_s21 = smov %s826_s24  ;;  %17 = sbr.rel (!%p15_p3) target bundleno = 3 (0x3), region = 75 }
 0x1f8   :  { %542 = vsyncpa [#allocation3], 1 }
 0x1f9   :  { %544 = vsyncpa [#allocation3 + $0x1], 1 }

</bundles_post_ra>
